<compile_context>
chip_gen: v6e
topology: v6e:2x2x1
jax: 0.10.0
libtpu: 0.0.40
codegen_flags: <defaults>
</compile_context>

<pallas_src>
import math

import jax
import jax.numpy as jnp
from jax.experimental import pallas as pl
from jax.experimental.pallas import tpu as pltpu


def make_mlp_kernel(num_layers, activations):
    """Kernel for: x_T -> [W_l @ h + b_l (+ReLU)]* -> sum(h * w_fc2, feature axis)."""

    def kernel(x_ref, *refs):
        # refs = (w1, b1, ..., wL, bL, w_fc2_col, out)
        out_ref = refs[-1]
        wfc_ref = refs[-2]                      # (embed_dim, 1)
        h = x_ref[...]                          # (feat, bm), batch on lanes
        for l in range(num_layers):
            w = refs[2 * l][...]                # (out, in)  -- PyTorch layout
            b = refs[2 * l + 1][...]            # (out, 1)   -- broadcasts over lanes
            h = jnp.dot(w, h, preferred_element_type=jnp.float32) + b
            if activations[l]:
                h = jnp.maximum(h, 0.0)
        # Final Linear(embed_dim, 1, bias=False): elementwise mul + sublane reduce
        # (VPU + XLU) instead of a degenerate N=1 MXU matmul.  Output is (1, bm),
        # lane-dense.
        out_ref[...] = jnp.sum(h * wfc_ref[...], axis=0, keepdims=True)

    return kernel


def _choose_bm(B):
    """Largest lane-aligned batch tile that still leaves >= 2 grid steps (v7x megacore);
    falls back to a single full-batch tile when B is not a multiple of 128."""
    if B % 128 == 0:
        for cand in (2048, 1024, 512, 256, 128):
            if B % cand == 0 and B // cand >= 2:
                return cand
    return B


def linear_emb_net_forward(x, layer_params, fc2_w, *, activations, bm=None):
    """x: (B, input_size) f32.  layer_params: list of (W (out,in), b (out,1)).
    fc2_w: (1, embed_dim) (PyTorch layout).  Returns (B, 1)."""
    B, input_size = x.shape
    num_layers = len(layer_params)
    if bm is None:
        bm = _choose_bm(B)
    assert B % bm == 0

    # Transpose once in the wrapper: batch goes onto the lane axis.
    x_t = x.T                                   # (input_size, B)
    wfc_col = fc2_w.T                           # (embed_dim, 1)

    flat_params = []
    for w, b in layer_params:
        flat_params += [w, b]
    flat_params.append(wfc_col)

    kernel = make_mlp_kernel(num_layers, activations)

    # x tile: full feature dim x bm batch columns (lane-dense, streamed over the grid).
    in_specs = [pl.BlockSpec((input_size, bm), lambda i: (0, i))]
    # Weights / biases: full-array blocks, identical for every grid step.
    for p in flat_params:
        in_specs.append(pl.BlockSpec(p.shape, lambda i: (0, 0)))
    # Output: (1, bm) row -- bm on the lane axis -> unmasked full-width stores.
    out_spec = pl.BlockSpec((1, bm), lambda i: (0, i))

    out_t = pl.pallas_call(
        kernel,
        out_shape=jax.ShapeDtypeStruct((1, B), jnp.float32),
        grid_spec=pltpu.PrefetchScalarGridSpec(
            num_scalar_prefetch=0,
            grid=(B // bm,),
            in_specs=in_specs,
            out_specs=out_spec,
        ),
        compiler_params=pltpu.CompilerParams(dimension_semantics=("parallel",)),
    )(x_t, *flat_params)

    # (1, B) -> (B, 1): pure metadata reshape outside the kernel.
    return out_t.reshape(B, 1)


def init_linear_emb_net(key, input_size, layers_data):
    """Deterministic re-implementation of initialize_weights:
    Linear.weight ~ N(0, sqrt(4/(in+out))), bias = 0.
    Weights kept in PyTorch (out, in) layout; biases as (out, 1) columns."""
    layer_params = []
    in_sz = input_size
    acts = []
    for size, act in layers_data:
        key, kw = jax.random.split(key)
        std = math.sqrt(4.0 / (in_sz + size))
        w = jax.random.normal(kw, (size, in_sz), dtype=jnp.float32) * std   # (out, in)
        b = jnp.zeros((size, 1), dtype=jnp.float32)                         # (out, 1)
        layer_params.append((w, b))
        acts.append(bool(act))
        in_sz = size
    embedding_dim = layers_data[-1][0] if layers_data else input_size
    key, kw = jax.random.split(key)
    std = math.sqrt(4.0 / (embedding_dim + 1))
    fc2_w = jax.random.normal(kw, (1, embedding_dim), dtype=jnp.float32) * std  # (1, embed)
    return layer_params, fc2_w, tuple(acts)


def reference_forward(x, layer_params, fc2_w, activations):
    """Pure-JAX batch-major reference mirroring the PyTorch module exactly."""
    h = x
    for (w, b), act in zip(layer_params, activations):
        h = h @ w.T + b.T
        if act:
            h = jnp.maximum(h, 0.0)
    return h @ fc2_w.T


if __name__ == "__main__":
    # Config consistent with the module: input_size=16, two hidden ReLU layers of 32.
    # Batch of 256 -> tile bm=128, grid of 2 "parallel" steps (keeps both v7x cores busy).
    B = 256
    input_size = 16
    layers_data = [(32, True), (32, True)]  # (size, has_ReLU_activation)

    key = jax.random.PRNGKey(0)
    key, kx = jax.random.split(key)
    x = jax.random.normal(kx, (B, input_size), dtype=jnp.float32)

    layer_params, fc2_w, activations = init_linear_emb_net(key, input_size, layers_data)

    out = linear_emb_net_forward(x, layer_params, fc2_w, activations=activations)
    out = jax.block_until_ready(out)

    ref = reference_forward(x, layer_params, fc2_w, activations)
    assert out.shape == (B, 1)
    assert jnp.allclose(out, ref, atol=1e-5, rtol=1e-5)

    print("KERNEL_OK")
</pallas_src>

<mosaic_0001>
module attributes {stable_mosaic.version = 11 : i64} {
  func.func @kernel(%arg0: i32, %arg1: memref<16x128xf32, #tpu.memory_space<vmem>>, %arg2: memref<32x16xf32, #tpu.memory_space<vmem>>, %arg3: memref<32x1xf32, #tpu.memory_space<vmem>>, %arg4: memref<32x32xf32, #tpu.memory_space<vmem>>, %arg5: memref<32x1xf32, #tpu.memory_space<vmem>>, %arg6: memref<32x1xf32, #tpu.memory_space<vmem>>, %arg7: memref<1x128xf32, #tpu.memory_space<vmem>>) attributes {dimension_semantics = [#tpu.dimension_semantics<parallel>], iteration_bounds = array<i64: 2>, scalar_prefetch = 0 : i64, scratch_operands = 0 : i64, tpu.core_type = #tpu.core_type<tc>, window_params = [{transform_indices = @transform_0, window_bounds = array<i64: 16, 128>}, {pipeline_mode = #tpu.pipeline_mode<synchronous>, transform_indices = @transform_1, window_bounds = array<i64: 32, 16>}, {pipeline_mode = #tpu.pipeline_mode<synchronous>, transform_indices = @transform_2, window_bounds = array<i64: 32, 1>}, {pipeline_mode = #tpu.pipeline_mode<synchronous>, transform_indices = @transform_3, window_bounds = array<i64: 32, 32>}, {pipeline_mode = #tpu.pipeline_mode<synchronous>, transform_indices = @transform_4, window_bounds = array<i64: 32, 1>}, {pipeline_mode = #tpu.pipeline_mode<synchronous>, transform_indices = @transform_5, window_bounds = array<i64: 32, 1>}, {transform_indices = @transform_6, window_bounds = array<i64: 1, 128>}]} {
    %c0 = arith.constant 0 : index
    %c0_0 = arith.constant 0 : index
    %0 = vector.load %arg1[%c0, %c0_0] : memref<16x128xf32, #tpu.memory_space<vmem>>, vector<16x128xf32>
    %c0_1 = arith.constant 0 : index
    %c0_2 = arith.constant 0 : index
    %1 = vector.load %arg2[%c0_1, %c0_2] : memref<32x16xf32, #tpu.memory_space<vmem>>, vector<32x16xf32>
    %c0_3 = arith.constant 0 : index
    %c0_4 = arith.constant 0 : index
    %2 = vector.load %arg3[%c0_3, %c0_4] : memref<32x1xf32, #tpu.memory_space<vmem>>, vector<32x1xf32>
    %cst = arith.constant dense<0.000000e+00> : vector<32x128xf32>
    %3 = tpu.matmul %1, %0, %cst {dimension_numbers = #tpu.dot_dimension_numbers<[1], [0], [0], [1], [0, 0, 1, 1], [], []>} : vector<32x16xf32>, vector<16x128xf32>, vector<32x128xf32> -> vector<32x128xf32>
    %4 = vector.broadcast %2 : vector<32x1xf32> to vector<32x128xf32>
    %5 = arith.addf %3, %4 : vector<32x128xf32>
    %cst_5 = arith.constant 0.000000e+00 : f32
    %6 = vector.broadcast %cst_5 : f32 to vector<32x128xf32>
    %7 = arith.maximumf %5, %6 : vector<32x128xf32>
    %c0_6 = arith.constant 0 : index
    %c0_7 = arith.constant 0 : index
    %8 = vector.load %arg4[%c0_6, %c0_7] : memref<32x32xf32, #tpu.memory_space<vmem>>, vector<32x32xf32>
    %c0_8 = arith.constant 0 : index
    %c0_9 = arith.constant 0 : index
    %9 = vector.load %arg5[%c0_8, %c0_9] : memref<32x1xf32, #tpu.memory_space<vmem>>, vector<32x1xf32>
    %cst_10 = arith.constant dense<0.000000e+00> : vector<32x128xf32>
    %10 = tpu.matmul %8, %7, %cst_10 {dimension_numbers = #tpu.dot_dimension_numbers<[1], [0], [0], [1], [0, 0, 1, 1], [], []>} : vector<32x32xf32>, vector<32x128xf32>, vector<32x128xf32> -> vector<32x128xf32>
    %11 = vector.broadcast %9 : vector<32x1xf32> to vector<32x128xf32>
    %12 = arith.addf %10, %11 : vector<32x128xf32>
    %cst_11 = arith.constant 0.000000e+00 : f32
    %13 = vector.broadcast %cst_11 : f32 to vector<32x128xf32>
    %14 = arith.maximumf %12, %13 : vector<32x128xf32>
    %c0_12 = arith.constant 0 : index
    %c0_13 = arith.constant 0 : index
    %15 = vector.load %arg6[%c0_12, %c0_13] : memref<32x1xf32, #tpu.memory_space<vmem>>, vector<32x1xf32>
    %16 = vector.broadcast %15 : vector<32x1xf32> to vector<32x128xf32>
    %17 = arith.mulf %14, %16 : vector<32x128xf32>
    %cst_14 = arith.constant dense<0.000000e+00> : vector<128xf32>
    %18 = vector.multi_reduction <add>, %17, %cst_14 [0] : vector<32x128xf32> to vector<128xf32>
    %19 = vector.shape_cast %18 : vector<128xf32> to vector<1x128xf32>
    %c0_15 = arith.constant 0 : index
    %c0_16 = arith.constant 0 : index
    %20 = vector.load %arg7[%c0_15, %c0_16] : memref<1x128xf32, #tpu.memory_space<vmem>>, vector<1x128xf32>
    tpu.vector_store %arg7[%c0_15, %c0_16], %19 {strides = array<i32>} : memref<1x128xf32, #tpu.memory_space<vmem>>, vector<1x128xf32>,
    return
  }
  func.func @transform_0(%arg0: i32) -> (i32, i32) {
    %c0_i32 = arith.constant 0 : i32
    %c0_i32_0 = arith.constant 0 : i32
    return %c0_i32, %arg0 : i32, i32
  }
  func.func @transform_1(%arg0: i32) -> (i32, i32) {
    %c0_i32 = arith.constant 0 : i32
    %c0_i32_0 = arith.constant 0 : i32
    %c0_i32_1 = arith.constant 0 : i32
    return %c0_i32, %c0_i32_0 : i32, i32
  }
  func.func @transform_2(%arg0: i32) -> (i32, i32) {
    %c0_i32 = arith.constant 0 : i32
    %c0_i32_0 = arith.constant 0 : i32
    %c0_i32_1 = arith.constant 0 : i32
    return %c0_i32, %c0_i32_0 : i32, i32
  }
  func.func @transform_3(%arg0: i32) -> (i32, i32) {
    %c0_i32 = arith.constant 0 : i32
    %c0_i32_0 = arith.constant 0 : i32
    %c0_i32_1 = arith.constant 0 : i32
    return %c0_i32, %c0_i32_0 : i32, i32
  }
  func.func @transform_4(%arg0: i32) -> (i32, i32) {
    %c0_i32 = arith.constant 0 : i32
    %c0_i32_0 = arith.constant 0 : i32
    %c0_i32_1 = arith.constant 0 : i32
    return %c0_i32, %c0_i32_0 : i32, i32
  }
  func.func @transform_5(%arg0: i32) -> (i32, i32) {
    %c0_i32 = arith.constant 0 : i32
    %c0_i32_0 = arith.constant 0 : i32
    %c0_i32_1 = arith.constant 0 : i32
    return %c0_i32, %c0_i32_0 : i32, i32
  }
  func.func @transform_6(%arg0: i32) -> (i32, i32) {
    %c0_i32 = arith.constant 0 : i32
    %c0_i32_0 = arith.constant 0 : i32
    return %c0_i32, %arg0 : i32, i32
  }
}

</mosaic_0001>

<bundles_post_ra>
// kernel: tpu_custom_call.1
= control target key start
LH: loop header
LB: loop body
LE: loop exit
PB: predicated region body
PF: predicated region fallthrough
CT: control target
= control target key end

     0   :  { %11 = vsyncpa [#allocation4], 0  ;;  %s1024_s0 = inlined_call_operand.vmem [shape: f32[16,256], index: 0, kind: input, shape index: {}]   ;;  %s1025_s1 = inlined_call_operand.vmem [shape: f32[32,16], index: 1, kind: input, shape index: {}]   ;;  %s1026_s2 = inlined_call_operand.vmem [shape: f32[32,1], index: 2, kind: input, shape index: {}]   ;;  %s1027_s3 = inlined_call_operand.vmem [shape: f32[32,32], index: 3, kind: input, shape index: {}]   ;;  %s1028_s4 = inlined_call_operand.vmem [shape: f32[32,1], index: 4, kind: input, shape index: {}]   ;;  %s1029_s5 = inlined_call_operand.vmem [shape: f32[32,1], index: 5, kind: input, shape index: {}]   ;;  %s1030_s6 = inlined_call_operand.hbm [shape: f32[1,256], index: 6, kind: output, shape index: {}]  }
   0x1   :  { %13 = vsyncpa [#allocation4 + $0x1], 0  ;;  %s859_s21 = smov 0   ;;  %s861_s22 = smov 0  }
   0x2   :  { %s863_s23 = smov 0   ;;  %s865_s24 = smov 0  }
   0x3 LB: > { %s661_s25 = sadd.s32 4294967295, %s820_s24   ;;  %s662_s26 = sadd.s32 4294967294, %s820_s24   ;;  %s820_s24 = sphi %s865_s24, %s1038_s24   ;;  %s816_s23 = sphi %s863_s23, %s1037_s23   ;;  %s812_s22 = sphi %s861_s22, %s1036_s22   ;;  %s808_s21 = sphi %s859_s21, %s1035_s21  }
   0x4   : > { %s882_s27 = sadd.s32 1, %s820_s24   ;;  %s26_s28 = sadd.s32 1, %s816_s23 }
   0x5   : > { %s23_s29 = ssub.s32 %s820_s24, %s882_s27  ;;  %p33_p0 = scmp.ne.s32.totalorder %s816_s23, %s812_s22 }
   0x6   : > { %p24_p1 = scmp.eq.s32.totalorder %s23_s29, 0  ;;  %p34_p2 = scmp.eq.s32.totalorder %s820_s24, 0 }
   0x7   : > { %p168_p3 = scmp.eq.s32.totalorder %s661_s25, 1  ;;  %p173_p4 = scmp.ne.s32.totalorder %s812_s22, %s808_s21 }
   0x8   : > { %s895_s30 = scalar_select %p24_p1, %s816_s23, %s26_s28  }
   0x9   : > { %p35_p5 = por %p34_p2, %p33_p0  ;;  %p897_p6 = por %p168_p3, %p33_p0 }
   0xa   : > { %p174_p7 = scmp.eq.s32.totalorder %s662_s26, 1  ;;  %p1031_p9 = scmp.ge.s32.totalorder %s820_s24, 2 }
   0xc   : > { %p901_p8 = por %p174_p7, %p173_p4  ;;  %205 = sbr.rel (%p1031_p9) target bundleno = 22 (0x16), region = 36 }
  0x11   : > { %208 = sbr.rel (!%p35_p5) target bundleno = 22 (0x16), region = 40  ;;  %s210_s9 = sand.u32 (%p35_p5), 1, %s816_s23  }
  0x12   : > { %s666_s10 = sshll.u32 (%p35_p5), %s820_s24, 3  ;;  %s665_s11 = sshll.u32 (%p35_p5), %s210_s9, 4 }
  0x13   : > { %s214_s14 = scalar_lea.vmem (%p35_p5), %s1024_s0, %s666_s10  ;;  %s212_s15 = scalar_lea.vmem (%p35_p5), [#allocation2], %s665_s11 }
  0x14   : > { %v245_v0 = vld [vmem:[%s214_s14] sm:$0xff] (%p35_p5)  ;;  %v247_v1 = vld [vmem:[%s214_s14 + $0x10] sm:$0xff] (%p35_p5) }
  0x15   : > { %246 = vst [vmem:[%s212_s15] sm:$0xff] (%p35_p5), %v245_v0  ;;  %248 = vst [vmem:[%s212_s15 + $0x8] sm:$0xff] (%p35_p5), %v247_v1 }
  0x16 PF: > { %p667_p10 = scmp.ge.s32.totalorder %s820_s24, 1  ;;  %p253_p11 = scmp.lt.s32.totalorder %s820_s24, 3 }
  0x18   : > { %p254_p12 = pnand %p667_p10, %p253_p11 }
  0x19   : > { %s916_s16 = sand.u32 (!%p254_p12), 1, %s812_s22   ;;  %s677_s17 = sshll.u32 (!%p254_p12), %s661_s25, 4 }
  0x1a   : > { %257 = sbr.rel (%p254_p12) target bundleno = 481 (0x1e1), region = 78  ;;  %s668_s19 = sshll.u32 (!%p254_p12), %s916_s16, 4 }
  0x1b   : > { %s262_s9 = scalar_lea.vmem (!%p254_p12), [#allocation2], %s668_s19  ;;  %s287_s18 = scalar_lea.vmem (!%p254_p12), [#allocation3], %s916_s16 }
  0x1c   : > { %s601_s19 = sshll.u32 (!%p254_p12), %s287_s18, 4  ;;  %s599_s28 = scalar_lea.hbm (!%p254_p12), %s1030_s6, %s677_s17  ;;  %s602_s19 = int_to_ptr.vmem [resolvable:$true] %s601_s19 }
  0x1d   : > { %s589_s29 = scalar_lea.sflag (!%p254_p12), [#allocation4], %s916_s16  ;;  %s823_s10 = smov (!%p254_p12), [#allocation3]  }
  0x1e   : > { %s764_s11 = sshll.u32 (!%p254_p12), %s823_s10, 4  ;;  %s765_s11 = int_to_ptr.vmem [resolvable:$false] %s764_s11 }
  0x1f   : > { %v290_v2 = vld [vmem:[%s1025_s1] sm:$0xff]  ;;  %vm318_vm0 = vcmask 130048   ;;  %v822_v3 = vmov 0   ;;  %v297_v4 = vld [vmem:[%s1026_s2 + $0x18] sm:$0xff]  ;;  %v295_v5 = vld [vmem:[%s1026_s2 + $0x8] sm:$0xff]  ;;  %vm448_vm1 = vcmask 261120   ;;  %p767_p2 = scmp.lt.s32.totalorder %s602_s19, %s765_s11 }
  0x20   : > { %698 = vmatprep.mubr.msk.f32.mxu0 %vm318_vm0, %v290_v2  ;;  %758 = vset.pattern.permute.xlu0 %v822_v3  ;;  %v289_v6 = vld [vmem:[%s262_s9 + $0x8] sm:$0xff]  ;;  %v288_v7 = vld [vmem:[%s262_s9] sm:$0xff]  ;;  %s760_s9 = scalar_lea.vmem %s602_s19, 16  ;;  %s766_s25 = scalar_lea.vmem %s765_s11, 32 }
  0x21   : > { %315 = vperm.xlu0 %758, %v297_v4   ;;  %759 = vset.pattern.permute.xlu1 %v822_v3  ;;  %v296_v8 = vld [vmem:[%s1026_s2 + $0x10] sm:$0xff]  ;;  %v294_v9 = vld [vmem:[%s1026_s2] sm:$0xff]  ;;  %v291_v10 = vld [vmem:[%s1025_s1 + $0x8] sm:$0xff]  ;;  %p761_p13 = scmp.ne.s32.totalorder %s602_s19, %s760_s9  ;;  %p768_p3 = scmp.lt.s32.totalorder %s766_s25, %s760_s9 }
  0x22   : > { %305 = vperm.xlu1 %759, %v295_v5   ;;  %694 = vmatprep.subr.mxu0 %v289_v6  ;;  %v292_v11 = vld [vmem:[%s1025_s1 + $0x10] sm:$0xff]  ;;  %v424_v12 = vld [vmem:[%s1028_s4] sm:$0xff]  ;;  %v425_v13 = vld [vmem:[%s1028_s4 + $0x8] sm:$0xff] }
  0x23   : > { %695 = vmatpush3.msra.mxu0 %v289_v6  ;;  %v293_v14 = vld [vmem:[%s1025_s1 + $0x18] sm:$0xff]  ;;  %v426_v15 = vld [vmem:[%s1028_s4 + $0x10] sm:$0xff]  ;;  %v550_v17 = vld [vmem:[%s1029_s5] sm:$0xff]  ;;  %p762_p0 = pnand %p761_p13, %p897_p6  ;;  %p769_p4 = por %p768_p3, %p767_p2 }
  0x24   : > { %696 = vmatprep.subr.mxu0 %v288_v7  ;;  %v427_v16 = vld [vmem:[%s1028_s4 + $0x18] sm:$0xff]  ;;  %v551_v18 = vld [vmem:[%s1029_s5 + $0x8] sm:$0xff]  ;;  %v552_v19 = vld [vmem:[%s1029_s5 + $0x10] sm:$0xff] }
  0x25   : > { %310 = vperm.xlu0 %758, %v296_v8   ;;  %697 = vmatpush3.msra.mxu0 %v288_v7  ;;  %v553_v20 = vld [vmem:[%s1029_s5 + $0x18] sm:$0xff]  ;;  %v420_v21 = vld [vmem:[%s1027_s3] sm:$0xff]  ;;  %v421_v38 = vld [vmem:[%s1027_s3 + $0x8] sm:$0xff]  ;;  %p763_p1 = pneg %p762_p0 }
  0x26   : > { %300 = vperm.xlu1 %759, %v294_v9   ;;  %699 = vmatmul.mubr.msk.f32.vlgmr.msra.gmra.mxu0 %vm318_vm0, %v291_v10  ;;  %v422_v39 = vld [vmem:[%s1027_s3 + $0x10] sm:$0xff]  ;;  %v423_v40 = vld [vmem:[%s1027_s3 + $0x18] sm:$0xff] }
  0x27   : > { %701 = vmatprep.mubr.msk.f32.mxu0 %vm318_vm0, %v292_v11  ;;  %712 = vmatprep.mubr.msk.f32.mxu1 %vm448_vm1, %v420_v21  ;;  %p770_p5 = pnand %p769_p4, %p763_p1 }
  0x29   : > { %430 = vperm.xlu0 %758, %v424_v12  }
  0x2a   : > { %435 = vperm.xlu1 %759, %v425_v13   ;;  %702 = vmatmul.mubr.msk.f32.gmra.mxu0 %vm318_vm0, %v293_v14 }
  0x2d   : > { %440 = vperm.xlu0 %758, %v426_v15  }
  0x2e   : > { %445 = vperm.xlu1 %759, %v427_v16  }
  0x31   : > { %556 = vperm.xlu0 %758, %v550_v17  }
  0x32   : > { %561 = vperm.xlu1 %759, %v551_v18  }
  0x35   : > { %566 = vperm.xlu0 %758, %v552_v19  }
  0x36   : > { %571 = vperm.xlu1 %759, %v553_v20  }
  0x9c   : > { %v316_v22 = vpop.permute.xlu0 %315 }
  0x9d   : > { %v306_v24 = vpop.permute.xlu1 %305 }
  0xa0   : > { %v311_v28 = vpop.permute.xlu0 %310 }
  0xa1   : > { %v301_v33 = vpop.permute.xlu1 %300 }
  0xa4   : > { %v431_v41 = vpop.permute.xlu0 %430 }
  0xa5   : > { %v436_v42 = vpop.permute.xlu1 %435 }
  0xa8   : > { %v441_v43 = vpop.permute.xlu0 %440 }
  0xa9   : > { %v446_v44 = vpop.permute.xlu1 %445 }
  0xac   : > { %v557_v49 = vpop.permute.xlu0 %556 }
  0xad   : > { %v562_v54 = vpop.permute.xlu1 %561 }
  0xb0   : > { %v567_v61 = vpop.permute.xlu0 %566 }
  0xb1   : > { %v572_v0 = vpop.permute.xlu1 %571 }
  0xe6   : > { %v700_v23 = vpop.f32.mrf.mxu0 }
  0xe7   : > { %v403_v30 = vadd.f32 %v700_v23, %v306_v24 }
  0xe8   : > { %v397_v25 = vpop.f32.mrf.mxu0 }
  0xe9   : > { %v398_v34 = vadd.f32 %v397_v25, %v301_v33  ;;  %v417_v36 = vmax.f32 %v403_v30, 0.0 }
  0xea   : > { %v703_v26 = vpop.f32.mrf.mxu0 }
  0xeb   : > { %v413_v27 = vadd.f32 %v703_v26, %v316_v22  ;;  %v416_v37 = vmax.f32 %v398_v34, 0.0 }
  0xec   : > { %v407_v29 = vpop.f32.mrf.mxu0 }
  0xed   : > { %v419_v31 = vmax.f32 %v413_v27, 0.0  ;;  %v408_v32 = vadd.f32 %v407_v29, %v311_v28 }
  0xef   : > { %v418_v35 = vmax.f32 %v408_v32, 0.0  ;;  %704 = vmatprep.subr.mxu1 %v419_v31 }
  0xf0   : > { %705 = vmatpush3.msra.mxu1 %v419_v31 }
  0xf1   : > { %706 = vmatprep.subr.mxu1 %v418_v35 }
  0xf2   : > { %707 = vmatpush3.msra.mxu1 %v418_v35 }
  0xf3   : > { %708 = vmatprep.subr.mxu1 %v417_v36 }
  0xf4   : > { %709 = vmatpush3.msra.mxu1 %v417_v36 }
  0xf5   : > { %710 = vmatprep.subr.mxu1 %v416_v37 }
  0xf6   : > { %711 = vmatpush3.msra.mxu1 %v416_v37 }
  0xf7   : > { %713 = vmatmul.mubr.msk.f32.vlgmr.msra.gmra.mxu1 %vm448_vm1, %v421_v38 }
  0xf8   : > { %715 = vmatprep.mubr.msk.f32.mxu1 %vm448_vm1, %v422_v39 }
  0xfb   : > { %716 = vmatmul.mubr.msk.f32.gmra.mxu1 %vm448_vm1, %v423_v40 }
 0x1b7   : > { %v714_v45 = vpop.f32.mrf.mxu1 }
 0x1b8   : > { %v533_v46 = vadd.f32 %v714_v45, %v436_v42 }
 0x1b9   : > { %v527_v47 = vpop.f32.mrf.mxu1 }
 0x1ba   : > { %v528_v48 = vadd.f32 %v527_v47, %v431_v41  ;;  %v547_v51 = vmax.f32 %v533_v46, 0.0 }
 0x1bb   : > { %v717_v50 = vpop.f32.mrf.mxu1 }
 0x1bc   : > { %v546_v52 = vmax.f32 %v528_v48, 0.0  ;;  %v543_v53 = vadd.f32 %v717_v50, %v446_v44  ;;  %v575_v58 = vmul.f32 %v562_v54, %v547_v51 }
 0x1bd   : > { %v537_v55 = vpop.f32.mrf.mxu1 }
 0x1be   : > { %v574_v56 = vmul.f32 %v557_v49, %v546_v52  ;;  %v538_v57 = vadd.f32 %v537_v55, %v441_v43  ;;  %v549_v59 = vmax.f32 %v543_v53, 0.0 }
 0x1c0   : > { %v548_v60 = vmax.f32 %v538_v57, 0.0  ;;  %v578_v62 = vadd.f32 %v575_v58, %v574_v56  ;;  %v577_v1 = vmul.f32 %v572_v0, %v549_v59 }
 0x1c2   : > { %v576_v63 = vmul.f32 %v567_v61, %v548_v60 }
 0x1c4   : > { %v579_v2 = vadd.f32 %v578_v62, %v576_v63 }
 0x1c6   : > { %v580_v3 = vadd.f32 %v579_v2, %v577_v1 }
 0x1c8   : > { %v581_v4 = vrot.slane %v580_v3, 4 }
 0x1ca   : > { %v582_v5 = vadd.f32 %v581_v4, %v580_v3 }
 0x1cc   : > { %v583_v6 = vrot.slane %v582_v5, 2 }
 0x1ce   : > { %v584_v7 = vadd.f32 %v583_v6, %v582_v5 }
 0x1d0   : > { %v585_v8 = vrot.slane %v584_v7, 1 }
 0x1d2   : > { %v586_v9 = vadd.f32 %v585_v8, %v584_v7 }
 0x1d4   : > { %587 = vst [vmem:[%s287_s18] sm:$0x1] %v586_v9 }
 0x1d5   : > { %773 = shalt.err (!%p770_p5)
}
 0x1d6   : > { %s774_s12 = scalar_lea.hbm %s599_s28, 16  ;;  %s778_s14 = scalar_lea.hbm %s1030_s6, 32 }
 0x1d7   : > { %p775_p7 = scmp.ne.s32.totalorder %s599_s28, %s774_s12  ;;  %p779_p12 = scmp.lt.s32.totalorder %s599_s28, %s1030_s6 }
 0x1d8   : > { %p780_p13 = scmp.lt.s32.totalorder %s778_s14, %s774_s12 }
 0x1d9   : > { %p776_p10 = pnand %p775_p7, %p897_p6 }
 0x1da   : > { %p781_p0 = por %p780_p13, %p779_p12 }
 0x1db   : > { %p777_p11 = pneg %p776_p10 }
 0x1dd   : > { %p782_p9 = pnand %p781_p0, %p777_p11 }
 0x1df   : > { %785 = shalt.err (!%p782_p9)
}
 0x1e0   : > { %718 = dma.vmem_to_hbm [thread:$0]  (%p897_p6), %s602_s19, 16, %s599_s28, %s589_s29  }
 0x1e1 PF: > { %s613_s18 = sand.u32 1, %s808_s21   ;;  %p1034_p1 = scmp.ge.s32.totalorder %s820_s24, 2 }
 0x1e2   : > { %s614_s20 = scalar_lea.sflag [#allocation4], %s613_s18 }
 0x1e3   : > { %p721_p2 = pnand %p1034_p1, %p901_p8 }
 0x1e5   : > { %p722_p3 = pneg %p721_p2 }
 0x1e7   : > { %803 = dma.done.wait (%p722_p3), %s614_s20, 16  }
 0x1e8   : > { %805 = vsyncadd (%p722_p3), %s614_s20, 4294967280  ;;  %p16_p9 = scmp.ge.s32.totalorder %s882_s27, 4   ;;  %s1035_s21 = smov %s812_s22 }
 0x1e9   : > { %s1036_s22 = smov %s816_s23  ;;  %s1037_s23 = smov %s895_s30 }
 0x1ea   : > { %s1038_s24 = smov %s882_s27  ;;  %18 = sbr.rel (!%p16_p9) target bundleno = 3 (0x3), region = 122 }
 0x1ef   :  { %618 = vsyncpa [#allocation4], 1 }
 0x1f0   :  { %620 = vsyncpa [#allocation4 + $0x1], 1 }

</bundles_post_ra>
